<compile_context>
chip_gen: v7x
topology: tpu7x:2x2x1
jax: 0.10.0
libtpu: 0.0.40
codegen_flags: <defaults>
</compile_context>

<pallas_src>
import functools

import jax
import jax.numpy as jnp
from jax.experimental import pallas as pl
from jax.experimental.pallas import tpu as pltpu


def _bn1d_stats_kernel(x_ref, gamma_ref, beta_ref, a_ref, b_ref,
                       sum_ref, sq_ref, *, eps, inv_count):
    """Accumulate per-channel sum / sumsq; finalize scale a_c and shift b_c."""
    ni = pl.program_id(0)
    li = pl.program_id(1)

    @pl.when(jnp.logical_and(ni == 0, li == 0))
    def _init():
        sum_ref[...] = jnp.zeros_like(sum_ref)
        sq_ref[...] = jnp.zeros_like(sq_ref)

    x = x_ref[0].astype(jnp.float32)                      # (C, L_tile)
    sum_ref[...] += jnp.sum(x, axis=1, keepdims=True)     # (C, 1)
    sq_ref[...] += jnp.sum(x * x, axis=1, keepdims=True)  # (C, 1)

    @pl.when(jnp.logical_and(ni == pl.num_programs(0) - 1,
                             li == pl.num_programs(1) - 1))
    def _finalize():
        # f32 accumulators; biased variance via E[x^2] - E[x]^2 (required for
        # the tiled one-traversal reduction).
        mean = sum_ref[...] * inv_count
        var = sq_ref[...] * inv_count - mean * mean
        inv_std = jax.lax.rsqrt(var + eps)
        a = gamma_ref[...].astype(jnp.float32) * inv_std
        a_ref[...] = a
        b_ref[...] = beta_ref[...].astype(jnp.float32) - mean * a


def _bn1d_apply_kernel(x_ref, a_ref, b_ref, o_ref):
    """y = x * a_c + b_c  (single FMA per element, memory-bound)."""
    x = x_ref[...].astype(jnp.float32)                    # (1, C, L_tile)
    y = x * a_ref[...][None] + b_ref[...][None]
    o_ref[...] = y.astype(o_ref.dtype)


def _pick_l_tile(l, c):
    """Largest lane-dense tile (multiple of 128) dividing L within a VMEM budget."""
    # ~4 MiB f32 per block keeps double-buffered in+out well under the 32 MiB
    # scoped default on every generation (incl. v7x's 64 MiB physical VMEM).
    budget_elems = (4 * 1024 * 1024) // 4
    for t in (2048, 1024, 512, 256, 128):
        if l % t == 0 and c * t <= budget_elems:
            return t
    # Small or oddly-sized L: use the full axis (block == full dim is legal).
    return l


def dynamic_batch_norm1d(x, gamma, beta, active_in_features=None, eps=1e-5):
    """Forward of DynamicBatchNorm1d (training-mode batch statistics).

    x:     (N, C, L)  -- PyTorch BatchNorm1d layout
    gamma: (in_features,)  beta: (in_features,)
    active_in_features: TOPK config; if set, the first `active_in_features`
        gamma/beta entries are used (x must then have that many channels).
    """
    n, c, l = x.shape
    if active_in_features is not None:
        # TOPK sub-selection of the affine parameters (glue, not hot path).
        gamma = gamma[:active_in_features]
        beta = beta[:active_in_features]
    assert gamma.shape[0] == c and beta.shape[0] == c

    gamma2d = gamma.reshape(c, 1).astype(jnp.float32)
    beta2d = beta.reshape(c, 1).astype(jnp.float32)

    l_tile = _pick_l_tile(l, c)
    n_l_tiles = l // l_tile
    grid = (n, n_l_tiles)
    inv_count = 1.0 / float(n * l)

    # ---- pass 1: per-channel statistics -> (a_c, b_c) ------------------------
    a_c, b_c = pl.pallas_call(
        functools.partial(_bn1d_stats_kernel, eps=float(eps), inv_count=inv_count),
        out_shape=(jax.ShapeDtypeStruct((c, 1), jnp.float32),
                   jax.ShapeDtypeStruct((c, 1), jnp.float32)),
        grid_spec=pltpu.PrefetchScalarGridSpec(
            num_scalar_prefetch=0,
            grid=grid,
            in_specs=[
                pl.BlockSpec((1, c, l_tile), lambda ni, li: (ni, 0, li)),
                pl.BlockSpec((c, 1), lambda ni, li: (0, 0)),
                pl.BlockSpec((c, 1), lambda ni, li: (0, 0)),
            ],
            out_specs=[
                pl.BlockSpec((c, 1), lambda ni, li: (0, 0)),
                pl.BlockSpec((c, 1), lambda ni, li: (0, 0)),
            ],
            scratch_shapes=[
                pltpu.VMEM((c, 1), jnp.float32),   # running sum
                pltpu.VMEM((c, 1), jnp.float32),   # running sum of squares
            ],
        ),
        compiler_params=pltpu.CompilerParams(
            dimension_semantics=("arbitrary", "arbitrary")),
    )(x, gamma2d, beta2d)

    # ---- pass 2: apply y = x * a_c + b_c -------------------------------------
    out = pl.pallas_call(
        _bn1d_apply_kernel,
        out_shape=jax.ShapeDtypeStruct((n, c, l), x.dtype),
        grid_spec=pltpu.PrefetchScalarGridSpec(
            num_scalar_prefetch=0,
            grid=grid,
            in_specs=[
                pl.BlockSpec((1, c, l_tile), lambda ni, li: (ni, 0, li)),
                pl.BlockSpec((c, 1), lambda ni, li: (0, 0)),
                pl.BlockSpec((c, 1), lambda ni, li: (0, 0)),
            ],
            out_specs=pl.BlockSpec((1, c, l_tile), lambda ni, li: (ni, 0, li)),
        ),
        compiler_params=pltpu.CompilerParams(
            dimension_semantics=("parallel", "parallel")),
    )(x, a_c, b_c)

    return out


if __name__ == "__main__":
    # Small shapes consistent with BatchNorm1d input (batch, channels, length).
    N, C, L = 2, 8, 16
    key = jax.random.PRNGKey(0)
    x = jax.random.normal(key, (N, C, L), dtype=jnp.float32)

    # Deterministic parameter init matching nn.BatchNorm1d.__init__:
    # weight = ones(in_features), bias = zeros(in_features).
    in_features = C
    gamma = jnp.ones((in_features,), dtype=jnp.float32)
    beta = jnp.zeros((in_features,), dtype=jnp.float32)

    y = dynamic_batch_norm1d(x, gamma, beta)
    y = jax.block_until_ready(y)

    # Pure-JAX reference (training-mode batch norm, biased variance).
    mean = jnp.mean(x, axis=(0, 2), keepdims=True)
    var = jnp.mean((x - mean) ** 2, axis=(0, 2), keepdims=True)
    ref = (x - mean) / jnp.sqrt(var + 1e-5) * gamma[None, :, None] + beta[None, :, None]
    assert jnp.allclose(y, ref, atol=1e-5, rtol=1e-5), "mismatch vs reference"

    print("KERNEL_OK")
</pallas_src>

<mosaic_0001>
module attributes {stable_mosaic.version = 11 : i64} {
  func.func @_bn1d_stats_kernel(%arg0: i32, %arg1: i32, %arg2: memref<1x8x16xf32, #tpu.memory_space<vmem>>, %arg3: memref<8x1xf32, #tpu.memory_space<vmem>>, %arg4: memref<8x1xf32, #tpu.memory_space<vmem>>, %arg5: memref<8x1xf32, #tpu.memory_space<vmem>>, %arg6: memref<8x1xf32, #tpu.memory_space<vmem>>, %arg7: memref<8x1xf32, #tpu.memory_space<vmem>>, %arg8: memref<8x1xf32, #tpu.memory_space<vmem>>) attributes {dimension_semantics = [#tpu.dimension_semantics<arbitrary>, #tpu.dimension_semantics<arbitrary>], iteration_bounds = array<i64: 2, 1>, scalar_prefetch = 0 : i64, scratch_operands = 2 : i64, tpu.core_type = #tpu.core_type<tc>, window_params = [{transform_indices = @transform_0, window_bounds = array<i64: 1, 8, 16>}, {pipeline_mode = #tpu.pipeline_mode<synchronous>, transform_indices = @transform_1, window_bounds = array<i64: 8, 1>}, {pipeline_mode = #tpu.pipeline_mode<synchronous>, transform_indices = @transform_2, window_bounds = array<i64: 8, 1>}, {pipeline_mode = #tpu.pipeline_mode<synchronous>, transform_indices = @transform_3, window_bounds = array<i64: 8, 1>}, {pipeline_mode = #tpu.pipeline_mode<synchronous>, transform_indices = @transform_4, window_bounds = array<i64: 8, 1>}]} {
    %c0_i32 = arith.constant 0 : i32
    %0 = arith.cmpi eq, %arg0, %c0_i32 : i32
    %c0_i32_0 = arith.constant 0 : i32
    %1 = arith.cmpi eq, %arg1, %c0_i32_0 : i32
    %2 = arith.andi %0, %1 : i1
    %3 = arith.extui %2 : i1 to i32
    %c0_i32_1 = arith.constant 0 : i32
    %4 = arith.cmpi ne, %3, %c0_i32_1 : i32
    scf.if %4 {
      %cst_15 = arith.constant 0.000000e+00 : f32
      %23 = vector.broadcast %cst_15 : f32 to vector<8x1xf32>
      %c0_16 = arith.constant 0 : index
      %c0_17 = arith.constant 0 : index
      %24 = vector.load %arg7[%c0_16, %c0_17] : memref<8x1xf32, #tpu.memory_space<vmem>>, vector<8x1xf32>
      tpu.vector_store %arg7[%c0_16, %c0_17], %23 {strides = array<i32>} : memref<8x1xf32, #tpu.memory_space<vmem>>, vector<8x1xf32>,
      %cst_18 = arith.constant 0.000000e+00 : f32
      %25 = vector.broadcast %cst_18 : f32 to vector<8x1xf32>
      %c0_19 = arith.constant 0 : index
      %c0_20 = arith.constant 0 : index
      %26 = vector.load %arg8[%c0_19, %c0_20] : memref<8x1xf32, #tpu.memory_space<vmem>>, vector<8x1xf32>
      tpu.vector_store %arg8[%c0_19, %c0_20], %25 {strides = array<i32>} : memref<8x1xf32, #tpu.memory_space<vmem>>, vector<8x1xf32>,
    } else {
    }
    %c0 = arith.constant 0 : index
    %c0_2 = arith.constant 0 : index
    %c0_3 = arith.constant 0 : index
    %5 = vector.load %arg2[%c0, %c0_2, %c0_3] : memref<1x8x16xf32, #tpu.memory_space<vmem>>, vector<1x8x16xf32>
    %6 = vector.shape_cast %5 : vector<1x8x16xf32> to vector<8x16xf32>
    %c0_4 = arith.constant 0 : index
    %c0_5 = arith.constant 0 : index
    %7 = vector.load %arg7[%c0_4, %c0_5] : memref<8x1xf32, #tpu.memory_space<vmem>>, vector<8x1xf32>
    %cst = arith.constant dense<0.000000e+00> : vector<8xf32>
    %8 = vector.multi_reduction <add>, %6, %cst [1] : vector<8x16xf32> to vector<8xf32>
    %9 = vector.shape_cast %8 : vector<8xf32> to vector<8x1xf32>
    %10 = arith.addf %7, %9 : vector<8x1xf32>
    %c0_6 = arith.constant 0 : index
    %c0_7 = arith.constant 0 : index
    %11 = vector.load %arg7[%c0_6, %c0_7] : memref<8x1xf32, #tpu.memory_space<vmem>>, vector<8x1xf32>
    tpu.vector_store %arg7[%c0_6, %c0_7], %10 {strides = array<i32>} : memref<8x1xf32, #tpu.memory_space<vmem>>, vector<8x1xf32>,
    %c0_8 = arith.constant 0 : index
    %c0_9 = arith.constant 0 : index
    %12 = vector.load %arg8[%c0_8, %c0_9] : memref<8x1xf32, #tpu.memory_space<vmem>>, vector<8x1xf32>
    %13 = arith.mulf %6, %6 : vector<8x16xf32>
    %cst_10 = arith.constant dense<0.000000e+00> : vector<8xf32>
    %14 = vector.multi_reduction <add>, %13, %cst_10 [1] : vector<8x16xf32> to vector<8xf32>
    %15 = vector.shape_cast %14 : vector<8xf32> to vector<8x1xf32>
    %16 = arith.addf %12, %15 : vector<8x1xf32>
    %c0_11 = arith.constant 0 : index
    %c0_12 = arith.constant 0 : index
    %17 = vector.load %arg8[%c0_11, %c0_12] : memref<8x1xf32, #tpu.memory_space<vmem>>, vector<8x1xf32>
    tpu.vector_store %arg8[%c0_11, %c0_12], %16 {strides = array<i32>} : memref<8x1xf32, #tpu.memory_space<vmem>>, vector<8x1xf32>,
    %c1_i32 = arith.constant 1 : i32
    %18 = arith.cmpi eq, %arg0, %c1_i32 : i32
    %c0_i32_13 = arith.constant 0 : i32
    %19 = arith.cmpi eq, %arg1, %c0_i32_13 : i32
    %20 = arith.andi %18, %19 : i1
    %21 = arith.extui %20 : i1 to i32
    %c0_i32_14 = arith.constant 0 : i32
    %22 = arith.cmpi ne, %21, %c0_i32_14 : i32
    scf.if %22 {
      %c0_15 = arith.constant 0 : index
      %c0_16 = arith.constant 0 : index
      %23 = vector.load %arg7[%c0_15, %c0_16] : memref<8x1xf32, #tpu.memory_space<vmem>>, vector<8x1xf32>
      %cst_17 = arith.constant 3.125000e-02 : f32
      %24 = vector.broadcast %cst_17 : f32 to vector<8x1xf32>
      %25 = arith.mulf %23, %24 : vector<8x1xf32>
      %c0_18 = arith.constant 0 : index
      %c0_19 = arith.constant 0 : index
      %26 = vector.load %arg8[%c0_18, %c0_19] : memref<8x1xf32, #tpu.memory_space<vmem>>, vector<8x1xf32>
      %cst_20 = arith.constant 3.125000e-02 : f32
      %27 = vector.broadcast %cst_20 : f32 to vector<8x1xf32>
      %28 = arith.mulf %26, %27 : vector<8x1xf32>
      %29 = arith.mulf %25, %25 : vector<8x1xf32>
      %30 = arith.subf %28, %29 : vector<8x1xf32>
      %cst_21 = arith.constant 9.99999974E-6 : f32
      %31 = vector.broadcast %cst_21 : f32 to vector<8x1xf32>
      %32 = arith.addf %30, %31 : vector<8x1xf32>
      %33 = math.rsqrt %32 : vector<8x1xf32>
      %c0_22 = arith.constant 0 : index
      %c0_23 = arith.constant 0 : index
      %34 = vector.load %arg3[%c0_22, %c0_23] : memref<8x1xf32, #tpu.memory_space<vmem>>, vector<8x1xf32>
      %35 = arith.mulf %34, %33 : vector<8x1xf32>
      %c0_24 = arith.constant 0 : index
      %c0_25 = arith.constant 0 : index
      %36 = vector.load %arg5[%c0_24, %c0_25] : memref<8x1xf32, #tpu.memory_space<vmem>>, vector<8x1xf32>
      tpu.vector_store %arg5[%c0_24, %c0_25], %35 {strides = array<i32>} : memref<8x1xf32, #tpu.memory_space<vmem>>, vector<8x1xf32>,
      %c0_26 = arith.constant 0 : index
      %c0_27 = arith.constant 0 : index
      %37 = vector.load %arg4[%c0_26, %c0_27] : memref<8x1xf32, #tpu.memory_space<vmem>>, vector<8x1xf32>
      %38 = arith.mulf %25, %35 : vector<8x1xf32>
      %39 = arith.subf %37, %38 : vector<8x1xf32>
      %c0_28 = arith.constant 0 : index
      %c0_29 = arith.constant 0 : index
      %40 = vector.load %arg6[%c0_28, %c0_29] : memref<8x1xf32, #tpu.memory_space<vmem>>, vector<8x1xf32>
      tpu.vector_store %arg6[%c0_28, %c0_29], %39 {strides = array<i32>} : memref<8x1xf32, #tpu.memory_space<vmem>>, vector<8x1xf32>,
    } else {
    }
    return
  }
  func.func @transform_0(%arg0: i32, %arg1: i32) -> (i32, i32, i32) {
    %c0_i32 = arith.constant 0 : i32
    %c0_i32_0 = arith.constant 0 : i32
    return %arg0, %c0_i32, %arg1 : i32, i32, i32
  }
  func.func @transform_1(%arg0: i32, %arg1: i32) -> (i32, i32) {
    %c0_i32 = arith.constant 0 : i32
    %c0_i32_0 = arith.constant 0 : i32
    %c0_i32_1 = arith.constant 0 : i32
    return %c0_i32, %c0_i32_0 : i32, i32
  }
  func.func @transform_2(%arg0: i32, %arg1: i32) -> (i32, i32) {
    %c0_i32 = arith.constant 0 : i32
    %c0_i32_0 = arith.constant 0 : i32
    %c0_i32_1 = arith.constant 0 : i32
    return %c0_i32, %c0_i32_0 : i32, i32
  }
  func.func @transform_3(%arg0: i32, %arg1: i32) -> (i32, i32) {
    %c0_i32 = arith.constant 0 : i32
    %c0_i32_0 = arith.constant 0 : i32
    %c0_i32_1 = arith.constant 0 : i32
    return %c0_i32, %c0_i32_0 : i32, i32
  }
  func.func @transform_4(%arg0: i32, %arg1: i32) -> (i32, i32) {
    %c0_i32 = arith.constant 0 : i32
    %c0_i32_0 = arith.constant 0 : i32
    %c0_i32_1 = arith.constant 0 : i32
    return %c0_i32, %c0_i32_0 : i32, i32
  }
}

</mosaic_0001>

<bundles_post_ra>
// kernel: tpu_custom_call.1
= control target key start
LH: loop header
LB: loop body
LE: loop exit
PB: predicated region body
PF: predicated region fallthrough
CT: control target
= control target key end

     0   :  { %s379_s15 = smov 0   ;;  %s381_s16 = smov 0   ;;  %s431_s0 = inlined_call_operand.vmem [shape: f32[2,8,16], index: 0, kind: input, shape index: {}]   ;;  %s432_s1 = inlined_call_operand.vmem [shape: f32[8,1], index: 1, kind: input, shape index: {}]   ;;  %s433_s2 = inlined_call_operand.vmem [shape: f32[8,1], index: 2, kind: input, shape index: {}]   ;;  %s434_s3 = inlined_call_operand.vmem [shape: f32[8,1], index: 3, kind: output, shape index: {0}]   ;;  %s435_s4 = inlined_call_operand.vmem [shape: f32[8,1], index: 4, kind: output, shape index: {1}]  }
   0x1   :  { %s383_s17 = smov 0  }
   0x2 LB: > { %s27_s18 = sadd.s32 1, %s347_s16  ;;  %p294_p0 = scmp.ge.s32.totalorder %s351_s17, 1  ;;  %s351_s17 = sphi %s383_s17, %s15_s17   ;;  %s347_s16 = sphi %s381_s16, %s437_s16   ;;  %s343_s15 = sphi %s379_s15, %s436_s15  }
   0x3   : > { %p29_p1 = scmp.ge.s32.totalorder %s27_s18, 2  ;;  %p171_p2 = scmp.lt.s32.totalorder %s351_s17, 3 }
   0x5   : > { %s439_s18 = smov (%p29_p1, %s27_s18), 0  ;;  %p172_p3 = pnand %p294_p0, %p171_p2 }
   0x6   : > { %p194_p4 = scmp.lt.s32.totalorder (!%p172_p3), %s343_s15, 1  ;;  %p201_p5 = scmp.eq.s32.totalorder (!%p172_p3), %s343_s15, 0 }
   0x7   : > { %175 = sbr.rel (%p172_p3) target bundleno = 204 (0xcc), region = 32 }
   0xe   : > { %s195_s19 = scalar_select %p194_p4, %s343_s15, 1 }
   0xf   : > { %206 = sbr.rel (!%p201_p5) target bundleno = 22 (0x16), region = 36  ;;  %vm207_vm0 = vcmask (%p201_p5), 7168   ;;  %v353_v0 = vmov (%p201_p5), 0.0  }
  0x10   : > { %s295_s20 = sshll.u32 %s195_s19, 3  ;;  %208 = vst.msk [vmem:[#allocation2] sm:$0xff] (%p201_p5), %vm207_vm0, %v353_v0  ;;  %209 = vst.msk [vmem:[#allocation3] sm:$0xff] (%p201_p5), %vm207_vm0, %v353_v0 }
  0x11   : > { %s200_s23 = scalar_lea.vmem %s431_s0, %s295_s20 }
  0x16 PF: > { %v210_v1 = vld [vmem:[%s200_s23] sm:$0xff]  ;;  %vm212_vm1 = vcmask 130048   ;;  %p226_p6 = scmp.eq.s32.totalorder %s343_s15, 1  ;;  %vm217_vm2 = vcmask 7168  }
  0x17   : > { %v213_v2 = vsel %vm212_vm1, %v210_v1, 0.0  ;;  %v220_v3 = vmul.f32 %v210_v1, %v210_v1  ;;  %v211_v5 = vld [vmem:[#allocation2] sm:$0xff]  ;;  %v219_v8 = vld [vmem:[#allocation3] sm:$0xff] }
  0x18   : > { %214 = vadd.xlane.f32.xlu0 %v213_v2  ;;  %v239_v18 = vld [vmem:[%s432_s1] sm:$0xff] (%p226_p6) }
  0x19   : > { %v221_v4 = vsel %vm212_vm1, %v220_v3, 0.0  ;;  %v242_v21 = vld [vmem:[%s433_s2] sm:$0xff] (%p226_p6) }
  0x1c   : > { %222 = vadd.xlane.f32.xlu0 %v221_v4 }
  0xa5   : > { %v215_v6 = vpop.xlane.xlu0 %214 }
  0xa6   : > { %v216_v7 = vadd.f32 %v215_v6, %v211_v5  ;;  %230 = sbr.rel (!%p226_p6) target bundleno = 204 (0xcc), region = 40 }
  0xa8   : > { %218 = vst.msk [vmem:[#allocation2] sm:$0xff] %vm217_vm2, %v216_v7 }
  0xa9   : > { %v223_v9 = vpop.xlane.xlu0 %222 }
  0xaa   : > { %v224_v10 = vadd.f32 %v223_v9, %v219_v8 }
  0xac   : > { %225 = vst.msk [vmem:[#allocation3] sm:$0xff] %vm217_vm2, %v224_v10 }
  0xaf   : > { %v231_v11 = vld [vmem:[#allocation2] sm:$0xff] }
  0xb0   : > { %v232_v13 = vmul.f32 0.03125, %v231_v11 }
  0xb2   : > { %v235_v15 = vmul.f32 %v232_v13, %v232_v13 }
  0xb3   : > { %v233_v12 = vld [vmem:[#allocation3] sm:$0xff] }
  0xb4   : > { %v234_v14 = vmul.f32 0.03125, %v233_v12 }
  0xb6   : > { %v236_v16 = vsub.f32 %v234_v14, %v235_v15 }
  0xb8   : > { %v237_v17 = vadd.f32 1e-05, %v236_v16 }
  0xba   : > { %327 = vrsqrt.f32 %v237_v17 }
  0xc4   : > { %v328_v19 = vpop.eup %327 }
  0xc5   : > { %v240_v20 = vmul.f32 %v328_v19, %v239_v18 }
  0xc7   : > { %241 = vst.msk [vmem:[%s434_s3] sm:$0xff] %vm217_vm2, %v240_v20  ;;  %v243_v22 = vmul.f32 %v240_v20, %v232_v13 }
  0xc9   : > { %v244_v23 = vsub.f32 %v242_v21, %v243_v22 }
  0xcb   : > { %245 = vst.msk [vmem:[%s435_s4] sm:$0xff] %vm217_vm2, %v244_v23 }
  0xcc PF: > { %s15_s17 = sadd.s32 1, %s351_s17   ;;  %s436_s15 = smov %s347_s16 }
  0xcd   : > { %p12_p7 = scmp.ge.s32.totalorder %s15_s17, 4   ;;  %s437_s16 = smov %s439_s18 }
  0xcf   :  { %14 = sbr.rel (!%p12_p7) target bundleno = 2 (0x2), region = 74 }

</bundles_post_ra>
